<compile_context>
chip_gen: v6e
topology: v6e:2x2x1
jax: 0.10.0
libtpu: 0.0.40
codegen_flags: <defaults>
</compile_context>

<pallas_src>
import functools

import jax
import jax.numpy as jnp
from jax.experimental import pallas as pl
from jax.experimental.pallas import tpu as pltpu


def _class_head_kernel(x_ref, w_ref, b_ref, o_ref):
    # x_ref: (1, C, thw)   pixels lane-dense
    # w_ref: (A2, C)       resident conv weight (PyTorch (A2, C, 1, 1) squeezed)
    # b_ref: (A2, 1)       resident f32 bias, broadcast over lanes
    # o_ref: (1, A2, thw)  lane-dense output tile
    x = x_ref[0]
    w = w_ref[...]
    acc = jnp.dot(w, x, preferred_element_type=jnp.float32)   # (A2, thw) f32
    o_ref[0] = (acc + b_ref[...]).astype(o_ref.dtype)


def _round_down_128(v):
    return (v // 128) * 128


def _round_up_128(v):
    return ((v + 127) // 128) * 128


def _choose_tile_hw(HW, tile_hw, N):
    """Pick a pixel-tile size that satisfies the (8,128)/full-dim rule,
    balances tiles, and keeps >=2 grid points for megacore when possible."""
    tile_hw = max(128, int(tile_hw))
    if HW <= tile_hw:
        # Whole row fits one tile.  If the batch axis alone gives no
        # parallelism (N == 1), split into two ~equal 128-multiple tiles so
        # v7x's second TensorCore is not idle.
        if N == 1 and HW >= 256:
            thw = min(_round_up_128((HW + 1) // 2), _round_down_128(HW))
            return max(128, thw)
        return HW                      # full-extent block (always legal)
    # thw < HW: must be a multiple of 128.  Balance so the last block is not
    # near-empty: n tiles of ~HW/n pixels, rounded up to 128.
    thw = max(128, _round_down_128(tile_hw))
    n_tiles = pl.cdiv(HW, thw)
    thw = max(128, _round_up_128(-(-HW // n_tiles)))   # <= original thw
    return thw


@functools.partial(jax.jit, static_argnames=("num_anchors", "tile_hw"))
def class_head_forward(x_nchw, weight, bias, *, num_anchors=3, tile_hw=2048):
    """Equivalent of ClassHead.forward.

    x_nchw: (N, C, H, W)          f32 or bf16
    weight: (A2, C)               PyTorch conv1x1 weight (A2, C, 1, 1) squeezed
    bias:   (A2,)
    returns (N, H*W*num_anchors, 2)
    """
    N, C, H, W = x_nchw.shape
    A2 = num_anchors * 2
    HW = H * W

    thw = _choose_tile_hw(HW, tile_hw, N)
    grid = (N, pl.cdiv(HW, thw))

    x_flat = x_nchw.reshape(N, C, HW)                 # free reshape, no transpose
    weight = weight.astype(x_nchw.dtype)              # no mixed-dtype promotion
    bias2d = bias.reshape(A2, 1).astype(jnp.float32)  # f32 bias add

    itemsize = x_nchw.dtype.itemsize
    # Double-buffered tile footprint -> scoped VMEM limit (v5e default is
    # 16 MiB; compute explicitly so large tiles don't OOM there).
    x_tile_bytes = C * thw * itemsize
    out_tile_bytes = A2 * thw * itemsize
    w_bytes = A2 * C * itemsize
    b_bytes = A2 * 4
    required = 2 * (x_tile_bytes + out_tile_bytes + w_bytes + b_bytes)
    vmem_limit = int(min(max(required + (2 << 20), 16 << 20), 128 << 20))

    flops = 2 * N * HW * C * A2
    bytes_accessed = (x_flat.size * itemsize
                      + N * A2 * HW * itemsize
                      + weight.size * itemsize
                      + bias2d.size * 4)

    out_na2hw = pl.pallas_call(
        _class_head_kernel,
        out_shape=jax.ShapeDtypeStruct((N, A2, HW), x_nchw.dtype),
        grid_spec=pltpu.PrefetchScalarGridSpec(
            num_scalar_prefetch=0,
            grid=grid,
            in_specs=[
                pl.BlockSpec((1, C, thw), lambda n, j: (n, 0, j)),   # x tile
                pl.BlockSpec((A2, C), lambda n, j: (0, 0)),          # weight (resident)
                pl.BlockSpec((A2, 1), lambda n, j: (0, 0)),          # bias (resident)
            ],
            out_specs=pl.BlockSpec((1, A2, thw), lambda n, j: (n, 0, j)),
        ),
        compiler_params=pltpu.CompilerParams(
            dimension_semantics=("parallel", "parallel"),
            vmem_limit_bytes=vmem_limit),
        cost_estimate=pl.CostEstimate(
            flops=flops, transcendentals=0, bytes_accessed=bytes_accessed),
    )(x_flat, weight, bias2d)

    # permute(0,2,3,1).view(N, -1, 2): only the tiny output is rearranged.
    out_nhw_a2 = jnp.transpose(out_na2hw, (0, 2, 1))           # (N, HW, A2)
    return out_nhw_a2.reshape(N, HW * num_anchors, 2)


def _reference_forward(x_nchw, weight, bias, num_anchors):
    """Pure-JAX reference matching the PyTorch semantics."""
    N, C, H, W = x_nchw.shape
    out_nchw = jnp.einsum("nchw,oc->nohw", x_nchw, weight) + bias[None, :, None, None]
    out_nhwc = jnp.transpose(out_nchw, (0, 2, 3, 1))
    return out_nhwc.reshape(N, -1, 2)


if __name__ == "__main__":
    # Small shapes consistent with the module (inchannels / num_anchors
    # configurable; modest sizes for the demo).
    N, C, H, W = 2, 32, 16, 16
    num_anchors = 3
    A2 = num_anchors * 2

    key = jax.random.PRNGKey(0)
    kx, kw, kb = jax.random.split(key, 3)

    x = jax.random.normal(kx, (N, C, H, W), dtype=jnp.float32)
    # Conv1x1 parameters in the PyTorch layout: weight (A2, C) (== (A2,C,1,1)
    # squeezed, no transpose), bias (A2,).
    fan_in = C
    weight = jax.random.uniform(
        kw, (A2, C), dtype=jnp.float32,
        minval=-1.0 / jnp.sqrt(fan_in), maxval=1.0 / jnp.sqrt(fan_in))
    bias = jax.random.uniform(
        kb, (A2,), dtype=jnp.float32,
        minval=-1.0 / jnp.sqrt(fan_in), maxval=1.0 / jnp.sqrt(fan_in))

    out = class_head_forward(x, weight, bias, num_anchors=num_anchors)
    out = jax.block_until_ready(out)

    ref = _reference_forward(x, weight, bias, num_anchors)
    assert out.shape == (N, H * W * num_anchors, 2), out.shape
    assert jnp.allclose(out, ref, atol=1e-5, rtol=1e-5), "mismatch vs reference"

    # Also exercise the N==1 megacore-split tiling path and bf16 activations.
    out1 = class_head_forward(x[:1].astype(jnp.bfloat16),
                              weight, bias, num_anchors=num_anchors)
    out1 = jax.block_until_ready(out1)
    ref1 = _reference_forward(x[:1].astype(jnp.bfloat16).astype(jnp.float32),
                              weight, bias, num_anchors)
    assert out1.shape == (1, H * W * num_anchors, 2), out1.shape
    assert jnp.allclose(out1.astype(jnp.float32), ref1, atol=5e-2, rtol=5e-2), \
        "bf16 mismatch vs reference"

    print("KERNEL_OK")
</pallas_src>

<mosaic_0001>
module attributes {stable_mosaic.version = 11 : i64} {
  func.func @_class_head_kernel(%arg0: i32, %arg1: i32, %arg2: memref<1x32x256xf32, #tpu.memory_space<vmem>>, %arg3: memref<6x32xf32, #tpu.memory_space<vmem>>, %arg4: memref<6x1xf32, #tpu.memory_space<vmem>>, %arg5: memref<1x6x256xf32, #tpu.memory_space<vmem>>) attributes {dimension_semantics = [#tpu.dimension_semantics<parallel>, #tpu.dimension_semantics<parallel>], iteration_bounds = array<i64: 2, 1>, scalar_prefetch = 0 : i64, scratch_operands = 0 : i64, tpu.core_type = #tpu.core_type<tc>, window_params = [{transform_indices = @transform_0, window_bounds = array<i64: 1, 32, 256>}, {pipeline_mode = #tpu.pipeline_mode<synchronous>, transform_indices = @transform_1, window_bounds = array<i64: 6, 32>}, {pipeline_mode = #tpu.pipeline_mode<synchronous>, transform_indices = @transform_2, window_bounds = array<i64: 6, 1>}, {transform_indices = @transform_3, window_bounds = array<i64: 1, 6, 256>}]} {
    %c0 = arith.constant 0 : index
    %c0_0 = arith.constant 0 : index
    %c0_1 = arith.constant 0 : index
    %0 = vector.load %arg2[%c0, %c0_0, %c0_1] : memref<1x32x256xf32, #tpu.memory_space<vmem>>, vector<1x32x256xf32>
    %1 = vector.shape_cast %0 : vector<1x32x256xf32> to vector<32x256xf32>
    %c0_2 = arith.constant 0 : index
    %c0_3 = arith.constant 0 : index
    %2 = vector.load %arg3[%c0_2, %c0_3] : memref<6x32xf32, #tpu.memory_space<vmem>>, vector<6x32xf32>
    %cst = arith.constant dense<0.000000e+00> : vector<6x256xf32>
    %3 = tpu.matmul %2, %1, %cst {dimension_numbers = #tpu.dot_dimension_numbers<[1], [0], [0], [1], [0, 0, 1, 1], [], []>} : vector<6x32xf32>, vector<32x256xf32>, vector<6x256xf32> -> vector<6x256xf32>
    %c0_4 = arith.constant 0 : index
    %c0_5 = arith.constant 0 : index
    %4 = vector.load %arg4[%c0_4, %c0_5] : memref<6x1xf32, #tpu.memory_space<vmem>>, vector<6x1xf32>
    %5 = vector.broadcast %4 : vector<6x1xf32> to vector<6x256xf32>
    %6 = arith.addf %3, %5 : vector<6x256xf32>
    %c0_6 = arith.constant 0 : index
    %c0_7 = arith.constant 0 : index
    %c0_8 = arith.constant 0 : index
    %7 = vector.load %arg5[%c0_6, %c0_7, %c0_8] : memref<1x6x256xf32, #tpu.memory_space<vmem>>, vector<1x6x256xf32>
    %8 = vector.shape_cast %7 : vector<1x6x256xf32> to vector<6x256xf32>
    %9 = vector.shape_cast %6 : vector<6x256xf32> to vector<1x6x256xf32>
    tpu.vector_store %arg5[%c0_6, %c0_7, %c0_8], %9 {strides = array<i32>} : memref<1x6x256xf32, #tpu.memory_space<vmem>>, vector<1x6x256xf32>,
    return
  }
  func.func @transform_0(%arg0: i32, %arg1: i32) -> (i32, i32, i32) {
    %c0_i32 = arith.constant 0 : i32
    %c0_i32_0 = arith.constant 0 : i32
    return %arg0, %c0_i32, %arg1 : i32, i32, i32
  }
  func.func @transform_1(%arg0: i32, %arg1: i32) -> (i32, i32) {
    %c0_i32 = arith.constant 0 : i32
    %c0_i32_0 = arith.constant 0 : i32
    %c0_i32_1 = arith.constant 0 : i32
    return %c0_i32, %c0_i32_0 : i32, i32
  }
  func.func @transform_2(%arg0: i32, %arg1: i32) -> (i32, i32) {
    %c0_i32 = arith.constant 0 : i32
    %c0_i32_0 = arith.constant 0 : i32
    %c0_i32_1 = arith.constant 0 : i32
    return %c0_i32, %c0_i32_0 : i32, i32
  }
  func.func @transform_3(%arg0: i32, %arg1: i32) -> (i32, i32, i32) {
    %c0_i32 = arith.constant 0 : i32
    %c0_i32_0 = arith.constant 0 : i32
    return %arg0, %c0_i32, %arg1 : i32, i32, i32
  }
}

</mosaic_0001>

<bundles_post_ra>
// kernel: class_head_forward.1
= control target key start
LH: loop header
LB: loop body
LE: loop exit
PB: predicated region body
PF: predicated region fallthrough
CT: control target
= control target key end

     0   :  { %s476_s12 = smov 0   ;;  %s478_s13 = smov 0   ;;  %s515_s0 = inlined_call_operand.vmem [shape: f32[2,32,256], index: 0, kind: input, shape index: {}]   ;;  %s516_s1 = inlined_call_operand.vmem [shape: f32[6,32], index: 1, kind: input, shape index: {}]   ;;  %s517_s2 = inlined_call_operand.vmem [shape: f32[6,1], index: 2, kind: input, shape index: {}]   ;;  %s518_s3 = inlined_call_operand.vmem [shape: f32[2,6,256], index: 3, kind: output, shape index: {}]  }
   0x1   :  { %s480_s14 = smov 0  }
   0x2 LB: > { %s25_s15 = sadd.s32 1, %s448_s13  ;;  %p393_p0 = scmp.ge.s32.totalorder %s452_s14, 1  ;;  %s452_s14 = sphi %s480_s14, %s13_s14   ;;  %s448_s13 = sphi %s478_s13, %s520_s13   ;;  %s444_s12 = sphi %s476_s12, %s519_s12  }
   0x3   : > { %p27_p1 = scmp.ge.s32.totalorder %s25_s15, 2  ;;  %p158_p2 = scmp.lt.s32.totalorder %s452_s14, 3 }
   0x5   : > { %s522_s15 = smov (%p27_p1, %s25_s15), 0  ;;  %p159_p3 = pnand %p393_p0, %p158_p2 }
   0x6   : > { %p191_p4 = scmp.lt.s32.totalorder (!%p159_p3), %s444_s12, 1 }
   0x7   : > { %162 = sbr.rel (%p159_p3) target bundleno = 222 (0xde), region = 32 }
   0xc   : > { %v454_v0 = vmov 0.0   ;;  %v455_v1 = vmov 0   ;;  %v219_v2 = vld [vmem:[%s517_s2] sm:$0x3f]  ;;  %s524_s12 = smov (!%p191_p4, %s444_s12), 1  ;;  %vm225_vm0 = vcmask 261120  }
   0xd   : > { %293 = vmatprep.mubr.f32.mxu0 %v454_v0  ;;  %429 = vset.pattern.permute.xlu0 %v455_v1  ;;  %s401_s18 = sshll.u32 %s524_s12, 6  ;;  %v218_v11 = vld [vmem:[%s516_s1] sm:$0x3f]  ;;  %s402_s24 = sshll.u32 %s524_s12, 4 }
   0xe   : > { %222 = vperm.xlu0 %429, %v219_v2   ;;  %s198_s21 = scalar_lea.vmem %s515_s0, %s401_s18  ;;  %s208_s27 = scalar_lea.vmem %s518_s3, %s402_s24 }
   0xf   : > { %v217_v3 = vld [vmem:[%s198_s21 + $0x38] sm:$0xff]  ;;  %v216_v4 = vld [vmem:[%s198_s21 + $0x30] sm:$0xff]  ;;  %v215_v5 = vld [vmem:[%s198_s21 + $0x28] sm:$0xff] }
  0x10   : > { %253 = vmatprep.subr.mxu0 %v217_v3  ;;  %v214_v6 = vld [vmem:[%s198_s21 + $0x20] sm:$0xff]  ;;  %v213_v7 = vld [vmem:[%s198_s21 + $0x18] sm:$0xff]  ;;  %v212_v8 = vld [vmem:[%s198_s21 + $0x10] sm:$0xff] }
  0x11   : > { %254 = vmatpush1.msra.mxu0 %v216_v4  ;;  %v211_v9 = vld [vmem:[%s198_s21 + $0x8] sm:$0xff]  ;;  %v210_v10 = vld [vmem:[%s198_s21] sm:$0xff] }
  0x12   : > { %255 = vmatprep.subr.mxu0 %v215_v5 }
  0x13   : > { %256 = vmatpush1.msra.mxu0 %v214_v6 }
  0x14   : > { %257 = vmatprep.subr.mxu0 %v213_v7 }
  0x15   : > { %258 = vmatpush1.msra.mxu0 %v212_v8 }
  0x16   : > { %259 = vmatprep.subr.mxu0 %v211_v9 }
  0x17   : > { %260 = vmatpush1.msra.mxu0 %v210_v10 }
  0x18   : > { %398 = vmatmul.mubr.msk.f32.vlgmr.msra.gmra.mxu0 %vm225_vm0, %v218_v11 }
  0x89   : > { %v223_v12 = vpop.permute.xlu0 %222 }
  0xd8   : > { %v295_v13 = vpop.f32.mrf.mxu0 }
  0xd9   : > { %v296_v14 = vadd.f32 %v295_v13, %v223_v12 }
  0xda   : > { %v297_v15 = vpop.f32.mrf.mxu0 }
  0xdb   : > { %300 = vst [vmem:[%s208_s27] sm:$0x3f] %v296_v14  ;;  %v298_v16 = vadd.f32 %v297_v15, %v223_v12 }
  0xdd   : > { %301 = vst [vmem:[%s208_s27 + $0x8] sm:$0x3f] %v298_v16 }
  0xde PF: > { %s13_s14 = sadd.s32 1, %s452_s14   ;;  %s519_s12 = smov %s448_s13 }
  0xdf   : > { %p10_p5 = scmp.ge.s32.totalorder %s13_s14, 4   ;;  %s520_s13 = smov %s522_s15 }
  0xe1   :  { %12 = sbr.rel (!%p10_p5) target bundleno = 2 (0x2), region = 62 }

</bundles_post_ra>
